<compile_context>
chip_gen: v7x
topology: tpu7x:2x2x1
jax: 0.10.0
libtpu: 0.0.40
codegen_flags: <defaults>
</compile_context>

<pallas_src>
import functools

import jax
import jax.numpy as jnp
from jax import lax
from jax.experimental import pallas as pl
from jax.experimental.pallas import tpu as pltpu


def _round_up(v, m):
    return (v + m - 1) // m * m


def _pick_tf(f_pad):
    """Filter-tile size: a multiple of 8 that divides f_pad exactly, preferring
    >= 2 grid steps (so v7x's two TensorCores both get work), capped at 256."""
    best = f_pad
    tf = 8
    while tf < f_pad:
        if f_pad % tf == 0 and tf <= 256:
            best = tf
        tf += 8
    return best


def _pick_vmem_limit():
    """Scoped-VMEM limit sized to the part (128 MiB v5e/v6e, 64 MiB v7x)."""
    try:
        cap = int(pltpu.get_tpu_info().vmem_capacity_bytes)
    except Exception:
        return None
    if cap <= 0:
        return None
    return min(cap * 3 // 4, 100 * 1024 * 1024)


def _bn_conv_relu_kernel(x_ref, w_ref, p_ref, o_ref, slab_ref, *,
                         N, C_pad, K, L_out, LP, eps):
    """Fused Conv1d + ReLU + BatchNorm1d (training-mode batch statistics).

    x_ref:    (N, C_pad, Lin)     zero-padded input (seq + channel padding), f32
    w_ref:    (TF, K*C_pad)       conv weights folded so one matmul covers all taps
    p_ref:    (TF, 3)             per-filter [conv_bias, bn_gamma, bn_beta], f32
    o_ref:    (N, TF, LP)         output in PyTorch (N, F, L) layout, LP % 128 == 0
    slab_ref: (K*C_pad, N*LP)     persistent VMEM im2col slab (matmul operand dtype)
    """
    # ---- im2col slab: built with statically aligned stores (row k*C_pad + c,
    # ---- per-batch lane block at n*LP).  Rebuilt per filter-tile step; the
    # ---- filter grid has <= 2 steps, so on v7x each core builds it once.
    slab_ref[...] = jnp.zeros_like(slab_ref)          # zero lane padding between blocks
    for n in range(N):                                # N, K are small static ints
        xn = x_ref[n]                                 # (C_pad, Lin) f32
        for k in range(K):
            tap = xn[:, k:k + L_out]                  # conv tap k (one lane shift, once)
            slab_ref[k * C_pad:(k + 1) * C_pad, n * LP:n * LP + L_out] = (
                tap.astype(slab_ref.dtype))

    # ---- Conv1d: one MXU matmul (bf16 operands, f32 accumulate), depth K*C_pad.
    y = jnp.dot(w_ref[...], slab_ref[...],
                preferred_element_type=jnp.float32)   # (TF, N*LP) f32

    p = p_ref[...]                                    # (TF, 3) = [bias, gamma, beta]
    y = jnp.maximum(y + p[:, 0:1], 0.0)               # conv bias + ReLU (f32, VPU)

    # Zero the lane-padding columns so they do not pollute the batch statistics.
    col = lax.broadcasted_iota(jnp.int32, (1, y.shape[1]), 1)
    y = jnp.where((col % LP) < L_out, y, 0.0)

    # ---- BatchNorm1d: one-pass biased batch stats per filter over (N, L_out).
    m_inv = 1.0 / (N * L_out)
    s1 = jnp.sum(y, axis=1, keepdims=True)            # (TF, 1)
    s2 = jnp.sum(y * y, axis=1, keepdims=True)        # (TF, 1)
    mean = s1 * m_inv
    var = jnp.maximum(s2 * m_inv - mean * mean, 0.0)   # clamp: rounding can go < 0
    scale = p[:, 1:2] * lax.rsqrt(var + eps)           # gamma * rsqrt(var + eps)  (EUP)
    shift = p[:, 2:3] - mean * scale                   # beta  - mean * scale
    out = y * scale + shift                            # 2-op per-element epilogue

    # ---- Store in (N, F, LP): each per-batch block starts on a 128-lane
    # ---- boundary and is a full-lane unmasked vst.
    for n in range(N):
        o_ref[n] = out[:, n * LP:(n + 1) * LP].astype(o_ref.dtype)


def bn_conv_relu(x, w, b, gamma, beta, *, padding, eps=1e-5,
                 matmul_dtype=jnp.bfloat16):
    """x: (N, C, L) f32; w: (F, C, K); b/gamma/beta: (F,). Returns (N, F, L_out)."""
    N, C, L = x.shape
    F, Cw, K = w.shape
    assert Cw == C
    Lin = L + 2 * padding
    L_out = Lin - K + 1
    assert L_out > 0

    C_pad = _round_up(C, 8)          # sublane-aligned tap blocks in the im2col slab
    F_pad = _round_up(F, 8)          # sublane-aligned filter (MXU M / output) axis
    LP = _round_up(L_out, 128)       # lane-aligned per-batch output block

    # One pad op provides both the conv zero padding and the channel alignment.
    x_p = jnp.pad(x, ((0, 0), (0, C_pad - C), (padding, padding)))

    # Weights folded to (F_pad, K*C_pad) so one matmul covers every tap; row
    # order k*C_pad + c matches the in-kernel slab.  Zero pad columns/rows are
    # exact no-ops in the dot.  Operands cast for the MXU (f32 accumulate).
    w_p = jnp.pad(w, ((0, F_pad - F), (0, C_pad - C), (0, 0)))
    w2 = jnp.transpose(w_p, (0, 2, 1)).reshape(F_pad, K * C_pad).astype(matmul_dtype)

    params = jnp.stack(
        [jnp.pad(b, (0, F_pad - F)),
         jnp.pad(gamma, (0, F_pad - F)),
         jnp.pad(beta, (0, F_pad - F))], axis=1).astype(jnp.float32)   # (F_pad, 3)

    TF = _pick_tf(F_pad)
    kernel = functools.partial(_bn_conv_relu_kernel, N=N, C_pad=C_pad, K=K,
                               L_out=L_out, LP=LP, eps=eps)

    out_full = pl.pallas_call(
        kernel,
        out_shape=jax.ShapeDtypeStruct((N, F_pad, LP), x.dtype),
        grid=(F_pad // TF,),
        in_specs=[
            pl.BlockSpec((N, C_pad, Lin), lambda i: (0, 0, 0)),
            pl.BlockSpec((TF, K * C_pad), lambda i: (i, 0)),
            pl.BlockSpec((TF, 3), lambda i: (i, 0)),
        ],
        out_specs=pl.BlockSpec((N, TF, LP), lambda i: (0, i, 0)),
        scratch_shapes=[pltpu.VMEM((K * C_pad, N * LP), matmul_dtype)],
        compiler_params=pltpu.CompilerParams(
            dimension_semantics=("parallel",),
            vmem_limit_bytes=_pick_vmem_limit(),
        ),
    )(x_p, w2, params)

    if F_pad == F and LP == L_out:
        return out_full
    return out_full[:, :F, :L_out]


def _reference(x, w, b, gamma, beta, *, padding, eps=1e-5, conv_dtype=None):
    """Pure-JAX reference matching PyTorch Conv1d -> ReLU -> BatchNorm1d(train).
    If conv_dtype is given, conv inputs are quantized to it (to mirror the
    kernel's MXU operand dtype) but all arithmetic stays f32."""
    if conv_dtype is not None:
        x = x.astype(conv_dtype).astype(jnp.float32)
        w = w.astype(conv_dtype).astype(jnp.float32)
    y = lax.conv_general_dilated(
        x, w, window_strides=(1,), padding=[(padding, padding)],
        dimension_numbers=('NCH', 'OIH', 'NCH'))
    y = y + b[None, :, None]
    y = jnp.maximum(y, 0.0)
    mean = jnp.mean(y, axis=(0, 2), keepdims=True)
    var = jnp.mean((y - mean) ** 2, axis=(0, 2), keepdims=True)  # biased (training)
    return (y - mean) / jnp.sqrt(var + eps) * gamma[None, :, None] + beta[None, :, None]


if __name__ == "__main__":
    # Module hyperparameters: input_channels=4, n_filters=8, kernel_size=3, padding=1
    N, C, L = 2, 4, 16
    F, K, P = 8, 3, 1

    key = jax.random.PRNGKey(0)
    kx, kw, kb, kg, kbe = jax.random.split(key, 5)
    x = jax.random.normal(kx, (N, C, L), jnp.float32)
    w = jax.random.normal(kw, (F, C, K), jnp.float32) * 0.2
    b = jax.random.normal(kb, (F,), jnp.float32) * 0.1
    gamma = jax.random.uniform(kg, (F,), jnp.float32, minval=0.5, maxval=1.5)
    beta = jax.random.normal(kbe, (F,), jnp.float32) * 0.1

    L_out = L + 2 * P - K + 1

    # (1) f32 MXU operands: checks the full kernel structure against the exact
    #     f32 module semantics.
    out_f32 = bn_conv_relu(x, w, b, gamma, beta, padding=P, matmul_dtype=jnp.float32)
    out_f32 = jax.block_until_ready(out_f32)
    ref_f32 = _reference(x, w, b, gamma, beta, padding=P)
    assert out_f32.shape == (N, F, L_out)
    assert jnp.allclose(out_f32, ref_f32, atol=1e-4, rtol=1e-4), "mismatch (f32 path)"

    # (2) bf16 MXU operands (the production path per the perf review), checked
    #     against a reference whose conv inputs are quantized identically.
    out = bn_conv_relu(x, w, b, gamma, beta, padding=P)   # default bf16 operands
    out = jax.block_until_ready(out)
    ref_q = _reference(x, w, b, gamma, beta, padding=P, conv_dtype=jnp.bfloat16)
    assert out.shape == (N, F, L_out)
    assert jnp.allclose(out, ref_q, atol=1e-4, rtol=1e-4), "mismatch (bf16 path)"

    print("KERNEL_OK")
</pallas_src>

<mosaic_0001>
module attributes {stable_mosaic.version = 11 : i64} {
  func.func @_bn_conv_relu_kernel(%arg0: i32, %arg1: memref<2x8x18xf32, #tpu.memory_space<vmem>>, %arg2: memref<8x24xf32, #tpu.memory_space<vmem>>, %arg3: memref<8x3xf32, #tpu.memory_space<vmem>>, %arg4: memref<2x8x128xf32, #tpu.memory_space<vmem>>, %arg5: memref<24x256xf32, #tpu.memory_space<vmem>>) attributes {dimension_semantics = [#tpu.dimension_semantics<parallel>], iteration_bounds = array<i64: 1>, scalar_prefetch = 0 : i64, scratch_operands = 1 : i64, tpu.core_type = #tpu.core_type<tc>, window_params = [{pipeline_mode = #tpu.pipeline_mode<synchronous>, transform_indices = @transform_0, window_bounds = array<i64: 2, 8, 18>}, {transform_indices = @transform_1, window_bounds = array<i64: 8, 24>}, {transform_indices = @transform_2, window_bounds = array<i64: 8, 3>}, {transform_indices = @transform_3, window_bounds = array<i64: 2, 8, 128>}]} {
    %cst = arith.constant 0.000000e+00 : f32
    %0 = vector.broadcast %cst : f32 to vector<24x256xf32>
    %c0 = arith.constant 0 : index
    %c0_0 = arith.constant 0 : index
    %1 = vector.load %arg5[%c0, %c0_0] : memref<24x256xf32, #tpu.memory_space<vmem>>, vector<24x256xf32>
    tpu.vector_store %arg5[%c0, %c0_0], %0 {strides = array<i32>} : memref<24x256xf32, #tpu.memory_space<vmem>>, vector<24x256xf32>,
    %c0_1 = arith.constant 0 : index
    %c0_2 = arith.constant 0 : index
    %c0_3 = arith.constant 0 : index
    %2 = vector.load %arg1[%c0_1, %c0_2, %c0_3] : memref<2x8x18xf32, #tpu.memory_space<vmem>>, vector<1x8x18xf32>
    %3 = vector.shape_cast %2 : vector<1x8x18xf32> to vector<8x18xf32>
    %4 = vector.extract_strided_slice %3 {offsets = [0, 0], sizes = [8, 16], strides = [1, 1]} : vector<8x18xf32> to vector<8x16xf32>
    %c0_4 = arith.constant 0 : index
    %c0_5 = arith.constant 0 : index
    %5 = vector.load %arg5[%c0_4, %c0_5] : memref<24x256xf32, #tpu.memory_space<vmem>>, vector<8x16xf32>
    tpu.vector_store %arg5[%c0_4, %c0_5], %4 {strides = array<i32>} : memref<24x256xf32, #tpu.memory_space<vmem>>, vector<8x16xf32>,
    %6 = vector.extract_strided_slice %3 {offsets = [0, 1], sizes = [8, 16], strides = [1, 1]} : vector<8x18xf32> to vector<8x16xf32>
    %c8 = arith.constant 8 : index
    %c0_6 = arith.constant 0 : index
    %7 = vector.load %arg5[%c8, %c0_6] : memref<24x256xf32, #tpu.memory_space<vmem>>, vector<8x16xf32>
    tpu.vector_store %arg5[%c8, %c0_6], %6 {strides = array<i32>} : memref<24x256xf32, #tpu.memory_space<vmem>>, vector<8x16xf32>,
    %8 = vector.extract_strided_slice %3 {offsets = [0, 2], sizes = [8, 16], strides = [1, 1]} : vector<8x18xf32> to vector<8x16xf32>
    %c16 = arith.constant 16 : index
    %c0_7 = arith.constant 0 : index
    %9 = vector.load %arg5[%c16, %c0_7] : memref<24x256xf32, #tpu.memory_space<vmem>>, vector<8x16xf32>
    tpu.vector_store %arg5[%c16, %c0_7], %8 {strides = array<i32>} : memref<24x256xf32, #tpu.memory_space<vmem>>, vector<8x16xf32>,
    %c1 = arith.constant 1 : index
    %c0_8 = arith.constant 0 : index
    %c0_9 = arith.constant 0 : index
    %10 = vector.load %arg1[%c1, %c0_8, %c0_9] : memref<2x8x18xf32, #tpu.memory_space<vmem>>, vector<1x8x18xf32>
    %11 = vector.shape_cast %10 : vector<1x8x18xf32> to vector<8x18xf32>
    %12 = vector.extract_strided_slice %11 {offsets = [0, 0], sizes = [8, 16], strides = [1, 1]} : vector<8x18xf32> to vector<8x16xf32>
    %c0_10 = arith.constant 0 : index
    %c128 = arith.constant 128 : index
    %13 = vector.load %arg5[%c0_10, %c128] : memref<24x256xf32, #tpu.memory_space<vmem>>, vector<8x16xf32>
    tpu.vector_store %arg5[%c0_10, %c128], %12 {strides = array<i32>} : memref<24x256xf32, #tpu.memory_space<vmem>>, vector<8x16xf32>,
    %14 = vector.extract_strided_slice %11 {offsets = [0, 1], sizes = [8, 16], strides = [1, 1]} : vector<8x18xf32> to vector<8x16xf32>
    %c8_11 = arith.constant 8 : index
    %c128_12 = arith.constant 128 : index
    %15 = vector.load %arg5[%c8_11, %c128_12] : memref<24x256xf32, #tpu.memory_space<vmem>>, vector<8x16xf32>
    tpu.vector_store %arg5[%c8_11, %c128_12], %14 {strides = array<i32>} : memref<24x256xf32, #tpu.memory_space<vmem>>, vector<8x16xf32>,
    %16 = vector.extract_strided_slice %11 {offsets = [0, 2], sizes = [8, 16], strides = [1, 1]} : vector<8x18xf32> to vector<8x16xf32>
    %c16_13 = arith.constant 16 : index
    %c128_14 = arith.constant 128 : index
    %17 = vector.load %arg5[%c16_13, %c128_14] : memref<24x256xf32, #tpu.memory_space<vmem>>, vector<8x16xf32>
    tpu.vector_store %arg5[%c16_13, %c128_14], %16 {strides = array<i32>} : memref<24x256xf32, #tpu.memory_space<vmem>>, vector<8x16xf32>,
    %c0_15 = arith.constant 0 : index
    %c0_16 = arith.constant 0 : index
    %18 = vector.load %arg2[%c0_15, %c0_16] : memref<8x24xf32, #tpu.memory_space<vmem>>, vector<8x24xf32>
    %c0_17 = arith.constant 0 : index
    %c0_18 = arith.constant 0 : index
    %19 = vector.load %arg5[%c0_17, %c0_18] : memref<24x256xf32, #tpu.memory_space<vmem>>, vector<24x256xf32>
    %cst_19 = arith.constant dense<0.000000e+00> : vector<8x256xf32>
    %20 = tpu.matmul %18, %19, %cst_19 {dimension_numbers = #tpu.dot_dimension_numbers<[1], [0], [0], [1], [0, 0, 1, 1], [], []>} : vector<8x24xf32>, vector<24x256xf32>, vector<8x256xf32> -> vector<8x256xf32>
    %c0_20 = arith.constant 0 : index
    %c0_21 = arith.constant 0 : index
    %21 = vector.load %arg3[%c0_20, %c0_21] : memref<8x3xf32, #tpu.memory_space<vmem>>, vector<8x3xf32>
    %22 = vector.extract_strided_slice %21 {offsets = [0, 0], sizes = [8, 1], strides = [1, 1]} : vector<8x3xf32> to vector<8x1xf32>
    %23 = vector.broadcast %22 : vector<8x1xf32> to vector<8x256xf32>
    %24 = arith.addf %20, %23 : vector<8x256xf32>
    %cst_22 = arith.constant 0.000000e+00 : f32
    %25 = vector.broadcast %cst_22 : f32 to vector<8x256xf32>
    %26 = arith.maximumf %24, %25 : vector<8x256xf32>
    %27 = tpu.iota {dimensions = array<i32: 1>} : vector<1x256xi32>
    %c128_i32 = arith.constant 128 : i32
    %c0_i32 = arith.constant 0 : i32
    %28 = arith.cmpi eq, %c128_i32, %c0_i32 : i32
    %c1_i32 = arith.constant 1 : i32
    %29 = arith.select %28, %c1_i32, %c128_i32 : i32
    %30 = vector.broadcast %29 : i32 to vector<1x256xi32>
    %31 = arith.remsi %27, %30 : vector<1x256xi32>
    %c0_i32_23 = arith.constant 0 : i32
    %32 = vector.broadcast %c0_i32_23 : i32 to vector<1x256xi32>
    %33 = arith.cmpi ne, %31, %32 : vector<1x256xi32>
    %c0_i32_24 = arith.constant 0 : i32
    %34 = vector.broadcast %c0_i32_24 : i32 to vector<1x256xi32>
    %35 = arith.cmpi slt, %31, %34 : vector<1x256xi32>
    %c0_i32_25 = arith.constant 0 : i32
    %36 = arith.cmpi slt, %29, %c0_i32_25 : i32
    %37 = vector.broadcast %36 : i1 to vector<1x256xi1>
    %38 = vector.broadcast %37 : vector<1x256xi1> to vector<1x256xi1>
    %39 = arith.xori %35, %38 : vector<1x256xi1>
    %40 = arith.andi %39, %33 : vector<1x256xi1>
    %41 = vector.broadcast %29 : i32 to vector<1x256xi32>
    %42 = arith.addi %31, %41 : vector<1x256xi32>
    %43 = arith.select %40, %42, %31 : vector<1x256xi1>, vector<1x256xi32>
    %c16_i32 = arith.constant 16 : i32
    %44 = vector.broadcast %c16_i32 : i32 to vector<1x256xi32>
    %45 = arith.cmpi slt, %43, %44 : vector<1x256xi32>
    %cst_26 = arith.constant 0.000000e+00 : f32
    %46 = vector.shape_cast %45 : vector<1x256xi1> to vector<1x256xi1>
    %47 = vector.broadcast %46 : vector<1x256xi1> to vector<8x256xi1>
    %48 = vector.broadcast %cst_26 : f32 to vector<8x256xf32>
    %49 = arith.select %47, %26, %48 : vector<8x256xi1>, vector<8x256xf32>
    %cst_27 = arith.constant dense<0.000000e+00> : vector<8xf32>
    %50 = vector.multi_reduction <add>, %49, %cst_27 [1] : vector<8x256xf32> to vector<8xf32>
    %51 = vector.shape_cast %50 : vector<8xf32> to vector<8x1xf32>
    %52 = arith.mulf %49, %49 : vector<8x256xf32>
    %cst_28 = arith.constant dense<0.000000e+00> : vector<8xf32>
    %53 = vector.multi_reduction <add>, %52, %cst_28 [1] : vector<8x256xf32> to vector<8xf32>
    %54 = vector.shape_cast %53 : vector<8xf32> to vector<8x1xf32>
    %cst_29 = arith.constant 3.125000e-02 : f32
    %55 = vector.broadcast %cst_29 : f32 to vector<8x1xf32>
    %56 = arith.mulf %51, %55 : vector<8x1xf32>
    %cst_30 = arith.constant 3.125000e-02 : f32
    %57 = vector.broadcast %cst_30 : f32 to vector<8x1xf32>
    %58 = arith.mulf %54, %57 : vector<8x1xf32>
    %59 = arith.mulf %56, %56 : vector<8x1xf32>
    %60 = arith.subf %58, %59 : vector<8x1xf32>
    %cst_31 = arith.constant 0.000000e+00 : f32
    %61 = vector.broadcast %cst_31 : f32 to vector<8x1xf32>
    %62 = arith.maximumf %60, %61 : vector<8x1xf32>
    %63 = vector.extract_strided_slice %21 {offsets = [0, 1], sizes = [8, 1], strides = [1, 1]} : vector<8x3xf32> to vector<8x1xf32>
    %cst_32 = arith.constant 9.99999974E-6 : f32
    %64 = vector.broadcast %cst_32 : f32 to vector<8x1xf32>
    %65 = arith.addf %62, %64 : vector<8x1xf32>
    %66 = math.rsqrt %65 : vector<8x1xf32>
    %67 = arith.mulf %63, %66 : vector<8x1xf32>
    %68 = vector.extract_strided_slice %21 {offsets = [0, 2], sizes = [8, 1], strides = [1, 1]} : vector<8x3xf32> to vector<8x1xf32>
    %69 = arith.mulf %56, %67 : vector<8x1xf32>
    %70 = arith.subf %68, %69 : vector<8x1xf32>
    %71 = vector.broadcast %67 : vector<8x1xf32> to vector<8x256xf32>
    %72 = arith.mulf %49, %71 : vector<8x256xf32>
    %73 = vector.broadcast %70 : vector<8x1xf32> to vector<8x256xf32>
    %74 = arith.addf %72, %73 : vector<8x256xf32>
    %75 = vector.extract_strided_slice %74 {offsets = [0, 0], sizes = [8, 128], strides = [1, 1]} : vector<8x256xf32> to vector<8x128xf32>
    %c0_33 = arith.constant 0 : index
    %c0_34 = arith.constant 0 : index
    %c0_35 = arith.constant 0 : index
    %76 = vector.load %arg4[%c0_33, %c0_34, %c0_35] : memref<2x8x128xf32, #tpu.memory_space<vmem>>, vector<1x8x128xf32>
    %77 = vector.shape_cast %76 : vector<1x8x128xf32> to vector<8x128xf32>
    %78 = vector.shape_cast %75 : vector<8x128xf32> to vector<1x8x128xf32>
    tpu.vector_store %arg4[%c0_33, %c0_34, %c0_35], %78 {strides = array<i32>} : memref<2x8x128xf32, #tpu.memory_space<vmem>>, vector<1x8x128xf32>,
    %79 = vector.extract_strided_slice %74 {offsets = [0, 128], sizes = [8, 128], strides = [1, 1]} : vector<8x256xf32> to vector<8x128xf32>
    %c1_36 = arith.constant 1 : index
    %c0_37 = arith.constant 0 : index
    %c0_38 = arith.constant 0 : index
    %80 = vector.load %arg4[%c1_36, %c0_37, %c0_38] : memref<2x8x128xf32, #tpu.memory_space<vmem>>, vector<1x8x128xf32>
    %81 = vector.shape_cast %80 : vector<1x8x128xf32> to vector<8x128xf32>
    %82 = vector.shape_cast %79 : vector<8x128xf32> to vector<1x8x128xf32>
    tpu.vector_store %arg4[%c1_36, %c0_37, %c0_38], %82 {strides = array<i32>} : memref<2x8x128xf32, #tpu.memory_space<vmem>>, vector<1x8x128xf32>,
    return
  }
  func.func @transform_0(%arg0: i32) -> (i32, i32, i32) {
    %c0_i32 = arith.constant 0 : i32
    %c0_i32_0 = arith.constant 0 : i32
    %c0_i32_1 = arith.constant 0 : i32
    %c0_i32_2 = arith.constant 0 : i32
    return %c0_i32, %c0_i32_0, %c0_i32_1 : i32, i32, i32
  }
  func.func @transform_1(%arg0: i32) -> (i32, i32) {
    %c0_i32 = arith.constant 0 : i32
    %c0_i32_0 = arith.constant 0 : i32
    return %arg0, %c0_i32 : i32, i32
  }
  func.func @transform_2(%arg0: i32) -> (i32, i32) {
    %c0_i32 = arith.constant 0 : i32
    %c0_i32_0 = arith.constant 0 : i32
    return %arg0, %c0_i32 : i32, i32
  }
  func.func @transform_3(%arg0: i32) -> (i32, i32, i32) {
    %c0_i32 = arith.constant 0 : i32
    %c0_i32_0 = arith.constant 0 : i32
    %c0_i32_1 = arith.constant 0 : i32
    return %c0_i32, %arg0, %c0_i32_0 : i32, i32, i32
  }
}

</mosaic_0001>

<bundles_post_ra>
// kernel: tpu_custom_call.1
= control target key start
LH: loop header
LB: loop body
LE: loop exit
PB: predicated region body
PF: predicated region fallthrough
CT: control target
= control target key end

     0   :  { %8 = vsyncpa [#allocation4], 0  ;;  %s388_s0 = inlined_call_operand.hbm [shape: f32[2,8,18], index: 0, kind: input, shape index: {}]   ;;  %s389_s1 = inlined_call_operand.vmem [shape: f32[8,24], index: 1, kind: input, shape index: {}]   ;;  %s390_s2 = inlined_call_operand.vmem [shape: f32[8,3], index: 2, kind: input, shape index: {}]   ;;  %s391_s3 = inlined_call_operand.hbm [shape: f32[2,8,128], index: 3, kind: output, shape index: {}]  }
   0x1   :  { %9 = vsyncpa [#allocation5], 0  ;;  %s310_s12 = smov [#allocation3]   ;;  %s262_s16 = scalar_lea.hbm %s388_s0, 256 }
   0x2   :  { %s15_s13 = sshll.u32 %s310_s12, 4  ;;  %p263_p0 = scmp.ne.s32.totalorder %s388_s0, %s262_s16  ;;  %s16_s13 = int_to_ptr.vmem [resolvable:$true] %s15_s13 }
   0x3   :  { %p266_p1 = scmp.lt.u32.totalorder %s262_s16, %s388_s0 }
   0x5   :  { %p268_p2 = pnand %p266_p1, %p263_p0 }
   0x7   :  { %271 = shalt.err (!%p268_p2)
}
   0x8   :  { %s272_s21 = scalar_lea.vmem %s16_s13, 256  ;;  %p277_p4 = scmp.lt.s32.totalorder %s16_s13, %s16_s13 }
   0x9   :  { %p273_p3 = scmp.ne.s32.totalorder %s16_s13, %s272_s21  ;;  %p278_p5 = scmp.lt.s32.totalorder %s272_s21, %s272_s21 }
   0xb   :  { %p279_p6 = por %p278_p5, %p277_p4 }
   0xd   :  { %p280_p7 = pnand %p279_p6, %p273_p3 }
   0xf   :  { %283 = shalt.err (!%p280_p7)
}
  0x10   :  { %s311_s22 = smov 128   ;;  %s312_s23 = smov 8  }
  0x11   :  { %21 = dma.hbm_to_vmem [thread:$0]  %s388_s0, 256, %s16_s13, [#allocation4], %s311_s22, %s311_s22, %s312_s23  }
  0x12   :  { %306 = dma.done.wait [#allocation4], 256  }
  0x13   :  { %307 = vsyncadd [#allocation4], 4294967040  ;;  %v313_v0 = vmov 0.0   ;;  %vm36_vm0 = vcmask 130048   ;;  %v48_v1 = vld [vmem:[#allocation3 + $0x8] sm:$0xff]  ;;  %v35_v2 = vld [vmem:[#allocation3] sm:$0xff]  ;;  %v149_v18 = vlaneseq }
  0x14   :  { %30 = vst [vmem:[#allocation2 + $0x8] sm:$0xff] %v313_v0  ;;  %29 = vst [vmem:[#allocation2] sm:$0xff] %v313_v0  ;;  %140 = vmatprep.mubr.f32.mxu0 %v313_v0  ;;  %s314_s26 = smov 127   ;;  %s315_s0 = smov 126   ;;  %v361_v3 = vld [vmem:[%s390_s2] sm:$0xff]  ;;  %v316_v4 = vmov 0  }
  0x15   :  { %31 = vst [vmem:[#allocation2 + $0x10] sm:$0xff] %v313_v0  ;;  %32 = vst [vmem:[#allocation2 + $0x18] sm:$0xff] %v313_v0  ;;  %51 = vrot.lane.b32.xlu0 %v48_v1, %s314_s26  ;;  %55 = vrot.lane.b32.xlu1 %v48_v1, %s315_s0  ;;  %v59_v17 = vld [vmem:[%s389_s1] sm:$0xff]  ;;  %vm72_vm1 = vcmask 195584   ;;  %v150_v19 = vand.u32 127, %v149_v18  ;;  %v317_v35 = vmov 1  }
  0x16   :  { %33 = vst [vmem:[#allocation2 + $0x20] sm:$0xff] %v313_v0  ;;  %34 = vst [vmem:[#allocation2 + $0x28] sm:$0xff] %v313_v0  ;;  %256 = vset.pattern.permute.xlu0 %v316_v4  ;;  %v318_v44 = vmov 2   ;;  %s319_s1 = smov 1   ;;  %s320_s30 = smov [#allocation6]  }
  0x17   :  { %49 = vst.msk [vmem:[#allocation2 + $0x8] sm:$0xff] %vm36_vm0, %v48_v1  ;;  %37 = vst.msk [vmem:[#allocation2] sm:$0xff] %vm36_vm0, %v35_v2  ;;  %v151_v20 = vadd.s32 128, %v150_v19  ;;  %vm176_vm2 = vcmp.lt.s32.totalorder %v150_v19, 16  ;;  %258 = vset.pattern.permute.xlu1 %v318_v44  ;;  %s228_s4 = sshll.u32 %s320_s30, 4  ;;  %s229_s4 = int_to_ptr.vmem [resolvable:$true] %s228_s4 }
  0x18   :  { %s284_s5 = scalar_lea.vmem %s229_s4, 256  ;;  %p289_p9 = scmp.lt.s32.totalorder %s229_s4, %s229_s4 }
  0x19   :  { %39 = vrot.lane.b32.xlu0 %v35_v2, %s314_s26  ;;  %43 = vrot.lane.b32.xlu1 %v35_v2, %s315_s0  ;;  %v163_v22 = vand.u32 127, %v151_v20  ;;  %p285_p8 = scmp.ne.s32.totalorder %s229_s4, %s284_s5  ;;  %p290_p10 = scmp.lt.s32.totalorder %s284_s5, %s284_s5 }
  0x1b   :  { %vm177_vm3 = vcmp.lt.s32.totalorder %v163_v22, 16  ;;  %p291_p11 = por %p290_p10, %p289_p9 }
  0x1d   :  { %69 = vperm.xlu0 %256, %v361_v3   ;;  %p292_p12 = pnand %p291_p11, %p285_p8 }
  0x1e   :  { %v61_v9 = vld [vmem:[#allocation2 + $0x8] sm:$0xff]  ;;  %v60_v12 = vld [vmem:[#allocation2] sm:$0xff] }
  0x21   :  { %257 = vset.pattern.permute.xlu0 %v317_v35 }
  0x87   :  { %v52_v5 = vpop.permute.xlu0 %51  ;;  %v56_v6 = vpop.permute.xlu1 %55 }
  0x88   :  { %54 = vst.msk [vmem:[#allocation2 + $0x18] sm:$0xff] %vm36_vm0, %v52_v5  ;;  %58 = vst.msk [vmem:[#allocation2 + $0x28] sm:$0xff] %vm36_vm0, %v56_v6 }
  0x8b   :  { %v40_v7 = vpop.permute.xlu0 %39  ;;  %v44_v8 = vpop.permute.xlu1 %43 }
  0x8c   :  { %42 = vst.msk [vmem:[#allocation2 + $0x10] sm:$0xff] %vm36_vm0, %v40_v7  ;;  %46 = vst.msk [vmem:[#allocation2 + $0x20] sm:$0xff] %vm36_vm0, %v44_v8 }
  0x8f   :  { %v63_v10 = vld [vmem:[#allocation2 + $0x18] sm:$0xff]  ;;  %v65_v15 = vld [vmem:[#allocation2 + $0x28] sm:$0xff] }
  0x90   :  { %v241_v11 = vpack.c.bf16 %v63_v10, %v61_v9 }
  0x92   :  { %242 = vmatprep.subr.bf16.mxu0 %v241_v11 }
  0x93   :  { %v62_v13 = vld [vmem:[#allocation2 + $0x10] sm:$0xff]  ;;  %v64_v16 = vld [vmem:[#allocation2 + $0x20] sm:$0xff] }
  0x94   :  { %v243_v14 = vpack.c.bf16 %v62_v13, %v60_v12 }
  0x96   :  { %244 = vmatpush1.bf16.msra.mxu0 %v243_v14 }
  0x97   :  { %80 = vmatprep.subr.mxu0 %v65_v15 }
  0x9a   :  { %81 = vmatpush1.msra.mxu0 %v64_v16 }
  0x9b   :  { %240 = vmatmul.mubr.msk.f32.vlgmr.msra.gmra.mrb[0].mxu0 %vm72_vm1, %v59_v17 }
  0x9c   :  { %v70_v21 = vpop.permute.xlu0 %69 }
 0x16e   :  { %v142_v23 = vpop.f32.mrb[0].mxu0 }
 0x16f   :  { %v143_v24 = vadd.f32 %v142_v23, %v70_v21  ;;  %v144_v25 = vpop.f32.mrb[1].mxu0 }
 0x170   :  { %v145_v26 = vadd.f32 %v144_v25, %v70_v21 }
 0x171   :  { %v147_v27 = vmax.f32 %v143_v24, 0.0 }
 0x172   :  { %v148_v28 = vmax.f32 %v145_v26, 0.0 }
 0x173   :  { %v182_v29 = vsel %vm176_vm2, %v147_v27, 0.0 }
 0x174   :  { %v183_v30 = vsel %vm177_vm3, %v148_v28, 0.0  ;;  %v187_v31 = vmul.f32 %v182_v29, %v182_v29 }
 0x175   :  { %v184_v32 = vadd.f32 %v183_v30, %v182_v29  ;;  %v188_v33 = vmul.f32 %v183_v30, %v183_v30 }
 0x177   :  { %185 = vadd.xlane.f32.xlu1 %v184_v32  ;;  %v189_v34 = vadd.f32 %v188_v33, %v187_v31 }
 0x179   :  { %190 = vadd.xlane.f32.xlu0 %v189_v34 }
 0x204   :  { %v186_v36 = vpop.xlane.xlu1 %185 }
 0x205   :  { %v192_v37 = vmul.f32 0.03125, %v186_v36 }
 0x206   :  { %v191_v38 = vpop.xlane.xlu0 %190 }
 0x207   :  { %v194_v39 = vmul.f32 %v192_v37, %v192_v37  ;;  %v193_v40 = vmul.f32 0.03125, %v191_v38 }
 0x209   :  { %v195_v41 = vsub.f32 %v193_v40, %v194_v39 }
 0x20b   :  { %v196_v42 = vmax.f32 %v195_v41, 0.0 }
 0x20d   :  { %v197_v43 = vadd.f32 1e-05, %v196_v42 }
 0x20f   :  { %260 = vrsqrt.f32 %v197_v43 }
 0x219   :  { %v261_v45 = vpop.eup %260 }
 0x21a   :  { %v199_v46 = vmul.f32 %v261_v45, %v361_v3 }
 0x21c   :  { %208 = vperm.xlu0 %257, %v199_v46   ;;  %v200_v47 = vmul.f32 %v199_v46, %v192_v37 }
 0x21e   :  { %202 = vrot.lane.b32.xlu1 %v200_v47, %s319_s1 }
 0x220   :  { %259 = vset.pattern.permute.xlu0 %v318_v44 }
 0x290   :  { %v203_v48 = vpop.permute.xlu1 %202 }
 0x291   :  { %v205_v49 = vsub.f32 %v361_v3, %v203_v48 }
 0x293   :  { %215 = vperm.xlu1 %258, %v205_v49  }
 0x29b   :  { %v209_v50 = vpop.permute.xlu0 %208 }
 0x29c   :  { %v211_v51 = vmul.f32 %v209_v50, %v182_v29  ;;  %v212_v52 = vmul.f32 %v209_v50, %v183_v30 }
 0x312   :  { %v216_v53 = vpop.permute.xlu1 %215 }
 0x313   :  { %v218_v54 = vadd.f32 %v216_v53, %v211_v51  ;;  %v219_v55 = vadd.f32 %v216_v53, %v212_v52 }
 0x315   :  { %220 = vst [vmem:[#allocation6] sm:$0xff] %v218_v54  ;;  %222 = vst [vmem:[#allocation6 + $0x8] sm:$0xff] %v219_v55 }
 0x316   :  { %295 = shalt.err (!%p292_p12)
}
 0x317   :  { %s296_s8 = scalar_lea.hbm %s391_s3, 256 }
 0x318   :  { %p297_p13 = scmp.ne.s32.totalorder %s391_s3, %s296_s8  ;;  %p300_p0 = scmp.lt.u32.totalorder %s296_s8, %s391_s3 }
 0x31a   :  { %p302_p1 = pnand %p300_p0, %p297_p13 }
 0x31c   :  { %305 = shalt.err (!%p302_p1)
}
 0x31d   :  { %234 = dma.vmem_to_hbm [thread:$0]  %s229_s4, 256, %s391_s3, [#allocation5], %s311_s22, %s311_s22, %s312_s23  }
 0x31e   :  { %308 = dma.done.wait [#allocation5], 256  }
 0x31f   :  { %309 = vsyncadd [#allocation5], 4294967040 }
 0x320   :  { %238 = vsyncpa [#allocation4], 1 }
 0x321   :  { %239 = vsyncpa [#allocation5], 1 }

</bundles_post_ra>
